<compile_context>
chip_gen: v5e
topology: v5e:2x2
jax: 0.10.0
libtpu: 0.0.40
codegen_flags: <defaults>
</compile_context>

<pallas_src>
import functools

import jax
import jax.numpy as jnp
from jax.experimental import pallas as pl
from jax.experimental.pallas import tpu as pltpu


def _maxpool1d_pad_same_kernel(x_ref, o_ref, *, kernel_size, pad_left, pad_right):
    """Fused SAME-pad -> MaxPool1d(kernel=k, stride=k) for one batch element.

    x_ref: (1, C, L)      channels -> sublanes, length -> lanes
    o_ref: (1, C, L_out)  L_out = (L - 1) // k + 1
    """
    k = kernel_size
    x = x_ref[0]                                   # (C, L)
    if k == 1:                                     # MaxPool1d(1, stride=1) == identity
        o_ref[0] = x
        return

    c, l_in = x.shape
    l_out = o_ref.shape[-1]

    # (1) SAME zero padding, done on the VMEM-resident tile.
    parts = []
    if pad_left > 0:
        parts.append(jnp.zeros((c, pad_left), x.dtype))
    parts.append(x)
    if pad_right > 0:
        parts.append(jnp.zeros((c, pad_right), x.dtype))
    xp = jnp.concatenate(parts, axis=-1)           # (C, L + k - 1)

    # (2) Stride-1 sliding max from k contiguous shifted views (VPU).
    m = xp[:, 0:l_in]                              # m[:, i] = max xp[:, i : i + k]
    for t in range(1, k):
        m = jnp.maximum(m, xp[:, t:t + l_in])      # (C, L)

    # (3) Stride-k subsample: out[:, j] = m[:, j*k], as an exact 0/1 column-selection
    # matmul on the MXU (contraction depth = L).
    rows = jax.lax.broadcasted_iota(jnp.int32, (l_in, l_out), 0)
    cols = jax.lax.broadcasted_iota(jnp.int32, (l_in, l_out), 1)
    sel = jnp.where(rows == cols * k, 1.0, 0.0).astype(jnp.bfloat16)   # (L, L_out)

    if m.dtype == jnp.bfloat16:
        # bf16 * exact-1.0 accumulated in f32 is exact: single matmul suffices.
        out = jnp.dot(m, sel, preferred_element_type=jnp.float32)
    else:
        # hi/lo bf16 split keeps the selection f32-faithful regardless of how the
        # MXU evaluates the multiply.
        m32 = m.astype(jnp.float32)
        m_hi = m32.astype(jnp.bfloat16)
        m_lo = (m32 - m_hi.astype(jnp.float32)).astype(jnp.bfloat16)
        out = (jnp.dot(m_hi, sel, preferred_element_type=jnp.float32)
               + jnp.dot(m_lo, sel, preferred_element_type=jnp.float32))
    o_ref[0] = out.astype(o_ref.dtype)


def maxpool1d_pad_same(x, kernel_size):
    """MyMaxPool1dPadSame.forward for x of shape (B, C, L)."""
    # TODO(synk): rank-2 (C, L) inputs (also accepted by nn.MaxPool1d) are not handled.
    b, c, l = x.shape
    k = int(kernel_size)
    p = max(0, k - 1)                              # SAME pad computed with stride=1
    pad_left = p // 2
    pad_right = p - pad_left
    l_out = (l - 1) // k + 1                       # MaxPool1d default stride == kernel_size

    kern = functools.partial(_maxpool1d_pad_same_kernel, kernel_size=k,
                             pad_left=pad_left, pad_right=pad_right)
    return pl.pallas_call(
        kern,
        out_shape=jax.ShapeDtypeStruct((b, c, l_out), x.dtype),
        grid=(b,),
        in_specs=[pl.BlockSpec((1, c, l), lambda i: (i, 0, 0))],
        out_specs=pl.BlockSpec((1, c, l_out), lambda i: (i, 0, 0)),
        compiler_params=pltpu.CompilerParams(dimension_semantics=("parallel",)),
    )(x)


def ref_maxpool1d_pad_same(x, kernel_size):
    """Pure-JAX reference with identical PyTorch semantics."""
    k = int(kernel_size)
    if k == 1:
        return x
    l = x.shape[-1]
    p = k - 1
    pad_left = p // 2
    pad_right = p - pad_left
    xp = jnp.pad(x, ((0, 0), (0, 0), (pad_left, pad_right)))
    l_out = (l - 1) // k + 1
    taps = [xp[:, :, t:t + (l_out - 1) * k + 1:k] for t in range(k)]
    return jnp.max(jnp.stack(taps, axis=0), axis=0)


if __name__ == "__main__":
    key = jax.random.PRNGKey(0)
    k1, k2 = jax.random.split(key)

    # Case 1: typical downsample pool (kernel_size=2); L_out = 128 -> lane-dense stores.
    B, C, L, K = 2, 16, 256, 2
    x1 = jax.random.normal(k1, (B, C, L), jnp.float32)
    run1 = jax.jit(functools.partial(maxpool1d_pad_same, kernel_size=K))
    y1 = jax.block_until_ready(run1(x1))
    r1 = ref_maxpool1d_pad_same(x1, K)
    assert y1.shape == (B, C, (L - 1) // K + 1)
    assert jnp.allclose(y1, r1, atol=1e-3, rtol=1e-3)

    # Case 2: odd kernel + non-dividing length exercises the asymmetric SAME pad and a
    # ragged (non-128-lane) output width.
    B2, C2, L2, K2 = 2, 8, 250, 3
    x2 = jax.random.normal(k2, (B2, C2, L2), jnp.float32)
    run2 = jax.jit(functools.partial(maxpool1d_pad_same, kernel_size=K2))
    y2 = jax.block_until_ready(run2(x2))
    r2 = ref_maxpool1d_pad_same(x2, K2)
    assert y2.shape == (B2, C2, (L2 - 1) // K2 + 1)
    assert jnp.allclose(y2, r2, atol=1e-3, rtol=1e-3)

    # Case 3: bf16 activations take the single-matmul MXU path (exact selection).
    x3 = x1.astype(jnp.bfloat16)
    y3 = jax.block_until_ready(run1(x3))
    r3 = ref_maxpool1d_pad_same(x3.astype(jnp.float32), K).astype(jnp.bfloat16)
    assert y3.dtype == jnp.bfloat16
    assert jnp.allclose(y3.astype(jnp.float32), r3.astype(jnp.float32),
                        atol=1e-2, rtol=1e-2)

    print("KERNEL_OK")
</pallas_src>

<mosaic_0001>
module attributes {stable_mosaic.version = 11 : i64} {
  func.func @_maxpool1d_pad_same_kernel(%arg0: i32, %arg1: memref<1x16x256xf32, #tpu.memory_space<vmem>>, %arg2: memref<1x16x128xf32, #tpu.memory_space<vmem>>) attributes {dimension_semantics = [#tpu.dimension_semantics<parallel>], iteration_bounds = array<i64: 2>, scalar_prefetch = 0 : i64, scratch_operands = 0 : i64, tpu.core_type = #tpu.core_type<tc>, window_params = [{transform_indices = @transform_0, window_bounds = array<i64: 1, 16, 256>}, {transform_indices = @transform_1, window_bounds = array<i64: 1, 16, 128>}]} {
    %c0 = arith.constant 0 : index
    %c0_0 = arith.constant 0 : index
    %c0_1 = arith.constant 0 : index
    %0 = vector.load %arg1[%c0, %c0_0, %c0_1] : memref<1x16x256xf32, #tpu.memory_space<vmem>>, vector<1x16x256xf32>
    %1 = vector.shape_cast %0 : vector<1x16x256xf32> to vector<16x256xf32>
    %cst = arith.constant 0.000000e+00 : f32
    %2 = vector.broadcast %cst : f32 to vector<16x1xf32>
    %3 = tpu.concatenate %1, %2 in 1 : vector<16x256xf32>, vector<16x1xf32> -> vector<16x257xf32>
    %4 = vector.extract_strided_slice %3 {offsets = [0, 0], sizes = [16, 256], strides = [1, 1]} : vector<16x257xf32> to vector<16x256xf32>
    %5 = vector.extract_strided_slice %3 {offsets = [0, 1], sizes = [16, 256], strides = [1, 1]} : vector<16x257xf32> to vector<16x256xf32>
    %6 = arith.maximumf %4, %5 : vector<16x256xf32>
    %7 = tpu.iota {dimensions = array<i32: 0>} : vector<256x128xi32>
    %8 = tpu.iota {dimensions = array<i32: 1>} : vector<256x128xi32>
    %c2_i32 = arith.constant 2 : i32
    %9 = vector.broadcast %c2_i32 : i32 to vector<256x128xi32>
    %10 = arith.muli %8, %9 : vector<256x128xi32>
    %11 = arith.cmpi eq, %7, %10 : vector<256x128xi32>
    %cst_2 = arith.constant 1.000000e+00 : f32
    %cst_3 = arith.constant 0.000000e+00 : f32
    %12 = vector.broadcast %cst_2 : f32 to vector<256x128xf32>
    %13 = vector.broadcast %cst_3 : f32 to vector<256x128xf32>
    %14 = arith.select %11, %12, %13 : vector<256x128xi1>, vector<256x128xf32>
    %15 = arith.truncf %14 : vector<256x128xf32> to vector<256x128xbf16>
    %16 = arith.truncf %6 : vector<16x256xf32> to vector<16x256xbf16>
    %17 = arith.extf %16 : vector<16x256xbf16> to vector<16x256xf32>
    %18 = arith.subf %6, %17 : vector<16x256xf32>
    %19 = arith.truncf %18 : vector<16x256xf32> to vector<16x256xbf16>
    %cst_4 = arith.constant dense<0.000000e+00> : vector<16x128xf32>
    %20 = tpu.matmul %16, %15, %cst_4 {dimension_numbers = #tpu.dot_dimension_numbers<[1], [0], [0], [1], [0, 0, 1, 1], [], []>} : vector<16x256xbf16>, vector<256x128xbf16>, vector<16x128xf32> -> vector<16x128xf32>
    %cst_5 = arith.constant dense<0.000000e+00> : vector<16x128xf32>
    %21 = tpu.matmul %19, %15, %cst_5 {dimension_numbers = #tpu.dot_dimension_numbers<[1], [0], [0], [1], [0, 0, 1, 1], [], []>} : vector<16x256xbf16>, vector<256x128xbf16>, vector<16x128xf32> -> vector<16x128xf32>
    %22 = arith.addf %20, %21 : vector<16x128xf32>
    %c0_6 = arith.constant 0 : index
    %c0_7 = arith.constant 0 : index
    %c0_8 = arith.constant 0 : index
    %23 = vector.load %arg2[%c0_6, %c0_7, %c0_8] : memref<1x16x128xf32, #tpu.memory_space<vmem>>, vector<1x16x128xf32>
    %24 = vector.shape_cast %23 : vector<1x16x128xf32> to vector<16x128xf32>
    %25 = vector.shape_cast %22 : vector<16x128xf32> to vector<1x16x128xf32>
    tpu.vector_store %arg2[%c0_6, %c0_7, %c0_8], %25 {strides = array<i32>} : memref<1x16x128xf32, #tpu.memory_space<vmem>>, vector<1x16x128xf32>,
    return
  }
  func.func @transform_0(%arg0: i32) -> (i32, i32, i32) {
    %c0_i32 = arith.constant 0 : i32
    %c0_i32_0 = arith.constant 0 : i32
    %c0_i32_1 = arith.constant 0 : i32
    return %arg0, %c0_i32, %c0_i32_0 : i32, i32, i32
  }
  func.func @transform_1(%arg0: i32) -> (i32, i32, i32) {
    %c0_i32 = arith.constant 0 : i32
    %c0_i32_0 = arith.constant 0 : i32
    %c0_i32_1 = arith.constant 0 : i32
    return %arg0, %c0_i32, %c0_i32_0 : i32, i32, i32
  }
}

</mosaic_0001>

<bundles_post_ra>
// kernel: maxpool1d_pad_same.1
= control target key start
LH: loop header
LB: loop body
LE: loop exit
PB: predicated region body
PF: predicated region fallthrough
CT: control target
= control target key end

     0   :  { %6 = vsyncpa [#allocation3], 0  ;;  %s957_s0 = inlined_call_operand.hbm [shape: f32[2,16,256], index: 0, kind: input, shape index: {}]   ;;  %s958_s1 = inlined_call_operand.hbm [shape: f32[2,16,128], index: 1, kind: output, shape index: {}]  }
   0x1   :  { %8 = vsyncpa [#allocation3 + $0x1], 0 }
   0x2   :  { %9 = vsyncpa [#allocation4], 0 }
   0x3   :  { %11 = vsyncpa [#allocation4 + $0x1], 0  ;;  %s702_s6 = smov 0   ;;  %s704_s7 = smov 0  }
   0x4   :  { %s706_s8 = smov 0   ;;  %s708_s9 = smov 0  }
   0x5 LB: > { %s723_s10 = sadd.s32 4294967295, %s683_s9   ;;  %s454_s11 = sadd.s32 4294967294, %s683_s9   ;;  %s683_s9 = sphi %s708_s9, %s968_s9   ;;  %s679_s8 = sphi %s706_s8, %s967_s8   ;;  %s675_s7 = sphi %s704_s7, %s966_s7   ;;  %s671_s6 = sphi %s702_s6, %s965_s6  }
   0x6   : > { %s727_s12 = sadd.s32 1, %s683_s9   ;;  %s24_s13 = sadd.s32 1, %s679_s8 }
   0x7   : > { %s21_s14 = ssub.s32 %s683_s9, %s727_s12  ;;  %p31_p0 = scmp.ne.s32.totalorder %s679_s8, %s675_s7 }
   0x8   : > { %p22_p1 = scmp.eq.s32.totalorder %s21_s14, 0  ;;  %p32_p2 = scmp.eq.s32.totalorder %s683_s9, 0 }
   0x9   : > { %p37_p3 = scmp.ne.s32.totalorder %s675_s7, %s671_s6  ;;  %p38_p4 = scmp.eq.s32.totalorder %s723_s10, 0 }
   0xa   : > { %s739_s15 = scalar_select %p22_p1, %s679_s8, %s24_s13  }
   0xb   : > { %p741_p5 = por %p32_p2, %p31_p0  ;;  %p745_p6 = por %p38_p4, %p37_p3 }
   0xc   : > { %p61_p7 = scmp.eq.s32.totalorder %s723_s10, 1  ;;  %p67_p8 = scmp.eq.s32.totalorder %s454_s11, 1 }
   0xd   : > { %p546_p10 = scmp.lt.s32.totalorder %s683_s9, 2  ;;  %s87_s20 = sand.u32 1, %s679_s8  }
   0xe   : > { %p752_p11 = por %p61_p7, %p31_p0  ;;  %p756_p12 = por %p67_p8, %p37_p3 }
   0xf   : > { %s532_s21 = sshll.u32 %s683_s9, 5  ;;  %s457_s22 = sshll.u32 %s87_s20, 5 }
  0x10   : > { %s96_s25 = scalar_lea.hbm %s957_s0, %s532_s21  ;;  %s91_s27 = scalar_lea.vmem [#allocation2], %s457_s22 }
  0x11   : > { %s97_s26 = sshll.u32 %s96_s25, 4  ;;  %s99_s28 = sshll.u32 %s91_s27, 4  ;;  %s98_s26 = int_to_ptr.hbm [resolvable:$true] %s97_s26  ;;  %s100_s28 = int_to_ptr.vmem [resolvable:$true] %s99_s28 }
  0x12   : > { %p767_p13 = pnand %p546_p10, %p741_p5  ;;  %p460_p0 = scmp.ge.s32.totalorder %s683_s9, 1 }
  0x13   : > { %p107_p1 = scmp.lt.s32.totalorder %s683_s9, 3  ;;  %s88_s30 = scalar_lea.sflag [#allocation3], %s87_s20 }
  0x14   : > { %s587_s2 = sshra.s32 %s98_s26, 4  ;;  %p591_p3 = pneg %p767_p13  ;;  %s588_s2 = int_to_ptr.hbm [resolvable:$true] %s587_s2 }
  0x15   : > { %s589_s3 = scalar_lea.hbm %s588_s2, 32  ;;  %s594_s11 = scalar_lea.hbm %s957_s0, 64 }
  0x16   : > { %p590_p2 = scmp.ne.s32.totalorder %s588_s2, %s589_s3  ;;  %p595_p5 = scmp.lt.s32.totalorder %s588_s2, %s957_s0 }
  0x17   : > { %p596_p8 = scmp.lt.s32.totalorder %s594_s11, %s589_s3 }
  0x18   : > { %p592_p4 = pnand %p591_p3, %p590_p2 }
  0x19   : > { %p597_p10 = por %p596_p8, %p595_p5 }
  0x1a   : > { %p593_p7 = pneg %p592_p4 }
  0x1c   : > { %p598_p9 = pnand %p597_p10, %p593_p7 }
  0x1e   : > { %601 = shalt.err (!%p598_p9)
}
  0x1f   : > { %s685_s16 = smov 256   ;;  %s686_s20 = smov 16  }
  0x20   : > { %541 = dma.hbm_to_vmem [thread:$0]  (!%p767_p13), %s98_s26, 512, %s100_s28, %s88_s30, %s685_s16, %s685_s16, %s686_s20  }
  0x21   : > { %p108_p2 = pnand %p460_p0, %p107_p1 }
  0x22   : > { %s788_s21 = sand.u32 (!%p108_p2), 1, %s675_s7  }
  0x23   : > { %111 = sbr.rel (%p108_p2) target bundleno = 323 (0x143), region = 24  ;;  %s461_s22 = sshll.u32 (!%p108_p2), %s788_s21, 5 }
  0x24   : > { %s114_s23 = scalar_lea.sflag (!%p108_p2), [#allocation3], %s788_s21  ;;  %s792_s24 = scalar_lea.vmem (!%p108_p2), [#allocation2], %s461_s22 }
  0x28   : > { %662 = dma.done.wait (%p745_p6), %s114_s23, 512  }
  0x29   : > { %664 = vsyncadd (%p745_p6), %s114_s23, 4294966784  ;;  %v169_v0 = vlaneseq  ;;  %v687_v1 = vmov 0.0   ;;  %s688_s25 = smov 127   ;;  %v815_v13 = vld [vmem:[%s792_s24] sm:$0xff]  ;;  %v818_v14 = vld [vmem:[%s792_s24 + $0x10] sm:$0xff]  ;;  %s462_s17 = sshll.u32 %s788_s21, 4 }
  0x2a   : > { %150 = vrot.lane.b32.xlu1 %v687_v1, %s688_s25  ;;  %146 = vrot.lane.b32.xlu0 %v815_v13, %s688_s25  ;;  %v826_v15 = vld [vmem:[%s792_s24 + $0x18] sm:$0xff]  ;;  %v689_v16 = vmov 1.0|1.0   ;;  %v839_v17 = vld [vmem:[%s792_s24 + $0x8] sm:$0xff]  ;;  %s533_s26 = sshll.u32 %s723_s10, 4  ;;  %s136_s30 = scalar_lea.vmem [#allocation5], %s462_s17 }
  0x2b   : > { %v799_v2 = vshrl.u32 %v169_v0, 7  ;;  %v203_v3 = vand.u32 127, %v169_v0  ;;  %154 = vrot.lane.b32.xlu2 %v826_v15, %s688_s25  ;;  %s377_s29 = scalar_lea.hbm %s958_s1, %s533_s26  ;;  %s378_s2 = sshll.u32 %s136_s30, 4  ;;  %s379_s2 = int_to_ptr.vmem [resolvable:$true] %s378_s2 }
  0x2c   : > { %s380_s3 = sshll.u32 %s377_s29, 4  ;;  %s366_s10 = scalar_lea.sflag [#allocation4], %s788_s21  ;;  %s381_s3 = int_to_ptr.hbm [resolvable:$true] %s380_s3 }
  0x2d   : > { %v184_v4 = vadd.s32 112, %v799_v2  ;;  %v185_v5 = vadd.s32 120, %v799_v2  ;;  %v803_v6 = vmul.u32 2, %v203_v3  ;;  %v200_v7 = vadd.s32 240, %v799_v2  ;;  %s631_s4 = sshra.s32 %s381_s3, 4  ;;  %s637_s14 = scalar_lea.hbm %s958_s1, 32  ;;  %s632_s4 = int_to_ptr.hbm [resolvable:$true] %s631_s4 }
  0x2e   : > { %v201_v8 = vadd.s32 248, %v799_v2  ;;  %v182_v9 = vadd.s32 96, %v799_v2  ;;  %v183_v10 = vadd.s32 104, %v799_v2  ;;  %v198_v11 = vadd.s32 224, %v799_v2  ;;  %s633_s5 = scalar_lea.hbm %s632_s4, 16  ;;  %p638_p0 = scmp.lt.s32.totalorder %s632_s4, %s958_s1 }
  0x2f   : > { %vm219_vm0 = vcmp.eq.s32.totalorder %v184_v4, %v803_v6  ;;  %vm220_vm1 = vcmp.eq.s32.totalorder %v185_v5, %v803_v6  ;;  %vm235_vm2 = vcmp.eq.s32.totalorder %v200_v7, %v803_v6  ;;  %v199_v12 = vadd.s32 232, %v799_v2  ;;  %p634_p6 = scmp.ne.s32.totalorder %s632_s4, %s633_s5  ;;  %p639_p1 = scmp.lt.s32.totalorder %s637_s14, %s633_s5 }
  0x30   : > { %vm236_vm3 = vcmp.eq.s32.totalorder %v201_v8, %v803_v6  ;;  %vm217_vm4 = vcmp.eq.s32.totalorder %v182_v9, %v803_v6  ;;  %vm218_vm5 = vcmp.eq.s32.totalorder %v183_v10, %v803_v6  ;;  %vm463_vm6 = vmpackc.low %vm220_vm1, %vm219_vm0  ;;  %vm233_vm7 = vcmp.eq.s32.totalorder %v198_v11, %v803_v6 }
  0x31   : > { %vm234_vm8 = vcmp.eq.s32.totalorder %v199_v12, %v803_v6  ;;  %vm479_vm9 = vmpackc.low %vm236_vm3, %vm235_vm2  ;;  %496 = vmatpush.bf16.msk.msra.mxu2 %vm463_vm6, %v689_v16  ;;  %464 = vmatpush.bf16.msk.msra.mxu0 %vm463_vm6, %v689_v16  ;;  %v180_v18 = vadd.s32 80, %v799_v2  ;;  %v181_v19 = vadd.s32 88, %v799_v2  ;;  %v196_v20 = vadd.s32 208, %v799_v2  ;;  %p635_p9 = pnand %p634_p6, %p752_p11  ;;  %p640_p3 = por %p639_p1, %p638_p0 }
  0x32   : > { %152 = vrot.lane.b32.xlu1 %v818_v14, %s688_s25  ;;  %512 = vmatpush.bf16.msk.msra.mxu3 %vm479_vm9, %v689_v16  ;;  %vm465_vm10 = vmpackc.low %vm218_vm5, %vm217_vm4  ;;  %v197_v21 = vadd.s32 216, %v799_v2  ;;  %v178_v22 = vadd.s32 64, %v799_v2  ;;  %v179_v23 = vadd.s32 72, %v799_v2  ;;  %v194_v24 = vadd.s32 192, %v799_v2 }
  0x33   : > { %480 = vmatpush.bf16.msk.msra.mxu1 %vm479_vm9, %v689_v16  ;;  %vm481_vm11 = vmpackc.low %vm234_vm8, %vm233_vm7  ;;  %148 = vrot.lane.b32.xlu0 %v839_v17, %s688_s25  ;;  %vm215_vm12 = vcmp.eq.s32.totalorder %v180_v18, %v803_v6  ;;  %vm216_vm13 = vcmp.eq.s32.totalorder %v181_v19, %v803_v6  ;;  %vm231_vm14 = vcmp.eq.s32.totalorder %v196_v20, %v803_v6  ;;  %v195_v25 = vadd.s32 200, %v799_v2  ;;  %p636_p13 = pneg %p635_p9 }
  0x34   : > { %vm232_vm15 = vcmp.eq.s32.totalorder %v197_v21, %v803_v6  ;;  %vm467_vm0 = vmpackc.low %vm216_vm13, %vm215_vm12  ;;  %vm213_vm2 = vcmp.eq.s32.totalorder %v178_v22, %v803_v6  ;;  %vm214_vm3 = vcmp.eq.s32.totalorder %v179_v23, %v803_v6  ;;  %vm229_vm4 = vcmp.eq.s32.totalorder %v194_v24, %v803_v6 }
  0x35   : > { %498 = vmatpush.bf16.msk.msra.mxu2 %vm465_vm10, %v689_v16  ;;  %466 = vmatpush.bf16.msk.msra.mxu0 %vm465_vm10, %v689_v16  ;;  %vm483_vm1 = vmpackc.low %vm232_vm15, %vm231_vm14  ;;  %vm230_vm6 = vcmp.eq.s32.totalorder %v195_v25, %v803_v6  ;;  %v176_v26 = vadd.s32 48, %v799_v2  ;;  %v177_v27 = vadd.s32 56, %v799_v2  ;;  %v192_v28 = vadd.s32 176, %v799_v2  ;;  %p641_p4 = pnand %p640_p3, %p636_p13 }
  0x36   : > { %514 = vmatpush.bf16.msk.msra.mxu3 %vm481_vm11, %v689_v16  ;;  %vm469_vm5 = vmpackc.low %vm214_vm3, %vm213_vm2  ;;  %v193_v29 = vadd.s32 184, %v799_v2  ;;  %v174_v30 = vadd.s32 32, %v799_v2  ;;  %v175_v31 = vadd.s32 40, %v799_v2  ;;  %v190_v32 = vadd.s32 160, %v799_v2 }
  0x37   : > { %482 = vmatpush.bf16.msk.msra.mxu1 %vm481_vm11, %v689_v16  ;;  %vm485_vm7 = vmpackc.low %vm230_vm6, %vm229_vm4  ;;  %vm211_vm8 = vcmp.eq.s32.totalorder %v176_v26, %v803_v6  ;;  %vm212_vm9 = vcmp.eq.s32.totalorder %v177_v27, %v803_v6  ;;  %vm227_vm10 = vcmp.eq.s32.totalorder %v192_v28, %v803_v6  ;;  %v191_v33 = vadd.s32 168, %v799_v2 }
  0x38   : > { %vm228_vm11 = vcmp.eq.s32.totalorder %v193_v29, %v803_v6  ;;  %vm471_vm12 = vmpackc.low %vm212_vm9, %vm211_vm8  ;;  %vm209_vm14 = vcmp.eq.s32.totalorder %v174_v30, %v803_v6  ;;  %vm210_vm15 = vcmp.eq.s32.totalorder %v175_v31, %v803_v6  ;;  %v172_v34 = vadd.s32 16, %v799_v2 }
  0x39   : > { %500 = vmatpush.bf16.msk.msra.mxu2 %vm467_vm0, %v689_v16  ;;  %468 = vmatpush.bf16.msk.msra.mxu0 %vm467_vm0, %v689_v16  ;;  %vm487_vm13 = vmpackc.low %vm228_vm11, %vm227_vm10  ;;  %vm225_vm0 = vcmp.eq.s32.totalorder %v190_v32, %v803_v6  ;;  %v173_v35 = vadd.s32 24, %v799_v2  ;;  %v188_v36 = vadd.s32 144, %v799_v2  ;;  %v189_v37 = vadd.s32 152, %v799_v2 }
  0x3a   : > { %516 = vmatpush.bf16.msk.msra.mxu3 %vm483_vm1, %v689_v16  ;;  %vm473_vm2 = vmpackc.low %vm210_vm15, %vm209_vm14  ;;  %vm207_vm4 = vcmp.eq.s32.totalorder %v172_v34, %v803_v6  ;;  %v171_v38 = vadd.s32 8, %v799_v2  ;;  %v186_v39 = vadd.s32 128, %v799_v2  ;;  %v187_v40 = vadd.s32 136, %v799_v2 }
  0x3b   : > { %484 = vmatpush.bf16.msk.msra.mxu1 %vm483_vm1, %v689_v16  ;;  %vm226_vm1 = vcmp.eq.s32.totalorder %v191_v33, %v803_v6  ;;  %vm223_vm6 = vcmp.eq.s32.totalorder %v188_v36, %v803_v6  ;;  %vm205_vm10 = vcmp.eq.s32.totalorder %v799_v2, %v803_v6 }
  0x3c   : > { %vm489_vm3 = vmpackc.low %vm226_vm1, %vm225_vm0  ;;  %vm206_vm11 = vcmp.eq.s32.totalorder %v171_v38, %v803_v6  ;;  %vm156_vm0 = vcmask 1039360  }
  0x3d   : > { %502 = vmatpush.bf16.msk.msra.mxu2 %vm469_vm5, %v689_v16  ;;  %470 = vmatpush.bf16.msk.msra.mxu0 %vm469_vm5, %v689_v16  ;;  %vm208_vm5 = vcmp.eq.s32.totalorder %v173_v35, %v803_v6  ;;  %vm477_vm14 = vmpackc.low %vm206_vm11, %vm205_vm10 }
  0x3e   : > { %518 = vmatpush.bf16.msk.msra.mxu3 %vm485_vm7, %v689_v16  ;;  %vm475_vm8 = vmpackc.low %vm208_vm5, %vm207_vm4 }
  0x3f   : > { %486 = vmatpush.bf16.msk.msra.mxu1 %vm485_vm7, %v689_v16  ;;  %vm224_vm7 = vcmp.eq.s32.totalorder %v189_v37, %v803_v6 }
  0x40   : > { %vm491_vm9 = vmpackc.low %vm224_vm7, %vm223_vm6 }
  0x41   : > { %504 = vmatpush.bf16.msk.msra.mxu2 %vm471_vm12, %v689_v16  ;;  %472 = vmatpush.bf16.msk.msra.mxu0 %vm471_vm12, %v689_v16  ;;  %vm221_vm12 = vcmp.eq.s32.totalorder %v186_v39, %v803_v6 }
  0x42   : > { %520 = vmatpush.bf16.msk.msra.mxu3 %vm487_vm13, %v689_v16 }
  0x43   : > { %488 = vmatpush.bf16.msk.msra.mxu1 %vm487_vm13, %v689_v16  ;;  %vm222_vm13 = vcmp.eq.s32.totalorder %v187_v40, %v803_v6 }
  0x44   : > { %vm493_vm15 = vmpackc.low %vm222_vm13, %vm221_vm12 }
  0x45   : > { %506 = vmatpush.bf16.msk.msra.mxu2 %vm473_vm2, %v689_v16  ;;  %474 = vmatpush.bf16.msk.msra.mxu0 %vm473_vm2, %v689_v16 }
  0x46   : > { %522 = vmatpush.bf16.msk.msra.mxu3 %vm489_vm3, %v689_v16 }
  0x47   : > { %490 = vmatpush.bf16.msk.msra.mxu1 %vm489_vm3, %v689_v16 }
  0x49   : > { %508 = vmatpush.bf16.msk.msra.mxu2 %vm475_vm8, %v689_v16  ;;  %476 = vmatpush.bf16.msk.msra.mxu0 %vm475_vm8, %v689_v16 }
  0x4a   : > { %524 = vmatpush.bf16.msk.msra.mxu3 %vm491_vm9, %v689_v16 }
  0x4b   : > { %492 = vmatpush.bf16.msk.msra.mxu1 %vm491_vm9, %v689_v16 }
  0x4d   : > { %510 = vmatpush.bf16.msk.msra.mxu2 %vm477_vm14, %v689_v16  ;;  %478 = vmatpush.bf16.msk.msra.mxu0 %vm477_vm14, %v689_v16 }
  0x4e   : > { %526 = vmatpush.bf16.msk.msra.mxu3 %vm493_vm15, %v689_v16 }
  0x4f   : > { %494 = vmatpush.bf16.msk.msra.mxu1 %vm493_vm15, %v689_v16 }
  0x85   : > { %v155_v42 = vpop.permute.xlu2 %154 }
  0x9c   : > { %v151_v41 = vpop.permute.xlu1 %150  ;;  %v147_v44 = vpop.permute.xlu0 %146 }
  0x9d   : > { %v160_v43 = vsel %vm156_vm0, %v155_v42, %v151_v41 }
  0x9e   : > { %v168_v47 = vmax.f32 %v826_v15, %v160_v43 }
  0xa4   : > { %v153_v45 = vpop.permute.xlu1 %152 }
  0xa5   : > { %v159_v46 = vsel %vm156_vm0, %v153_v45, %v155_v42  ;;  %v149_v50 = vpop.permute.xlu0 %148 }
  0xa6   : > { %v167_v48 = vmax.f32 %v818_v14, %v159_v46  ;;  %v157_v51 = vsel %vm156_vm0, %v147_v44, %v149_v50  ;;  %v158_v52 = vsel %vm156_vm0, %v149_v50, %v151_v41 }
  0xa7   : > { %v165_v53 = vmax.f32 %v815_v13, %v157_v51  ;;  %v166_v54 = vmax.f32 %v839_v17, %v158_v52 }
  0xa8   : > { %v286_v49 = vpack.c.bf16 %v168_v47, %v167_v48 }
  0xa9   : > { %v285_v57 = vpack.c.bf16 %v166_v54, %v165_v53 }
  0xaa   : > { %v289_v55 = vunpack.c.l.bf16 %v286_v49  ;;  %v290_v56 = vunpack.c.h.bf16 %v286_v49  ;;  %v329_v58 = vunpack.c.l.b16 %v286_v49  ;;  %v330_v59 = vunpack.c.h.b16 %v286_v49 }
  0xab   : > { %v327_v60 = vunpack.c.l.b16 %v285_v57  ;;  %v328_v61 = vunpack.c.h.b16 %v285_v57  ;;  %v287_v62 = vunpack.c.l.bf16 %v285_v57  ;;  %v288_v63 = vunpack.c.h.bf16 %v285_v57 }
  0xac   : > { %v293_v0 = vsub.f32 %v167_v48, %v289_v55  ;;  %v294_v1 = vsub.f32 %v168_v47, %v290_v56 }
  0xad   : > { %v331_v2 = vpack.c.b16 %v329_v58, %v327_v60  ;;  %v332_v3 = vpack.c.b16 %v330_v59, %v328_v61  ;;  %v291_v4 = vsub.f32 %v165_v53, %v287_v62  ;;  %v292_v5 = vsub.f32 %v166_v54, %v288_v63 }
  0xaf   : > { %343 = vmatmul.bf16.vlgmr.msra.gmra.mxu2 %v331_v2  ;;  %357 = vmatmul.bf16.vlgmr.msra.gmra.mxu3 %v332_v3  ;;  %v295_v6 = vpack.c.bf16 %v293_v0, %v291_v4  ;;  %v296_v7 = vpack.c.bf16 %v294_v1, %v292_v5 }
  0xb1   : > { %305 = vmatmul.bf16.vlgmr.msra.gmra.mxu0 %v295_v6  ;;  %319 = vmatmul.bf16.vlgmr.msra.gmra.mxu1 %v296_v7 }
 0x12e   : > { %v306_v8 = vpop.f32.mrf.mxu0  ;;  %v320_v9 = vpop.f32.mrf.mxu1 }
 0x12f   : > { %v321_v10 = vadd.f32 %v320_v9, %v306_v8 }
 0x132   : > { %v344_v11 = vpop.f32.mrf.mxu2  ;;  %v358_v12 = vpop.f32.mrf.mxu3 }
 0x133   : > { %v345_v13 = vadd.f32 %v344_v11, %v321_v10 }
 0x135   : > { %v359_v14 = vadd.f32 %v358_v12, %v345_v13 }
 0x136   : > { %v308_v15 = vpop.f32.mrf.mxu0  ;;  %v322_v16 = vpop.f32.mrf.mxu1 }
 0x137   : > { %363 = vst [vmem:[%s136_s30] sm:$0xff] %v359_v14  ;;  %v323_v17 = vadd.f32 %v322_v16, %v308_v15 }
 0x13a   : > { %v346_v18 = vpop.f32.mrf.mxu2  ;;  %v360_v20 = vpop.f32.mrf.mxu3 }
 0x13b   : > { %v347_v19 = vadd.f32 %v346_v18, %v323_v17 }
 0x13d   : > { %v361_v21 = vadd.f32 %v360_v20, %v347_v19 }
 0x13f   : > { %364 = vst [vmem:[%s136_s30 + $0x8] sm:$0xff] %v361_v21 }
 0x140   : > { %644 = shalt.err (!%p641_p4)
}
 0x141   : > { %s690_s21 = smov 128   ;;  %s691_s22 = smov 8  }
 0x142   : > { %536 = dma.vmem_to_hbm [thread:$0]  (%p752_p11), %s379_s2, 256, %s381_s3, %s366_s10, %s690_s21, %s690_s21, %s691_s22  }
 0x143 PF: > { %s395_s23 = sand.u32 1, %s671_s6   ;;  %p964_p7 = scmp.ge.s32.totalorder %s683_s9, 2 }
 0x144   : > { %s396_s24 = scalar_lea.sflag [#allocation4], %s395_s23 }
 0x145   : > { %p543_p5 = pnand %p964_p7, %p756_p12 }
 0x147   : > { %p544_p8 = pneg %p543_p5 }
 0x149   : > { %666 = dma.done.wait (%p544_p8), %s396_s24, 256  }
 0x14a   : > { %668 = vsyncadd (%p544_p8), %s396_s24, 4294967040  ;;  %p14_p10 = scmp.ge.s32.totalorder %s727_s12, 4   ;;  %s965_s6 = smov %s675_s7 }
 0x14b   : > { %s966_s7 = smov %s679_s8  ;;  %s967_s8 = smov %s739_s15 }
 0x14c   : > { %s968_s9 = smov %s727_s12  ;;  %16 = sbr.rel (!%p14_p10) target bundleno = 5 (0x5), region = 69 }
 0x151   :  { %402 = vsyncpa [#allocation3], 1 }
 0x152   :  { %404 = vsyncpa [#allocation3 + $0x1], 1 }
 0x153   :  { %405 = vsyncpa [#allocation4], 1 }
 0x154   :  { %407 = vsyncpa [#allocation4 + $0x1], 1 }

</bundles_post_ra>
